<compile_context>
chip_gen: v6e
topology: v6e:2x2x1
jax: 0.10.0
libtpu: 0.0.40
codegen_flags: <defaults>
</compile_context>

<pallas_src>
import functools
import math

import jax
import jax.numpy as jnp
from jax import lax
from jax.experimental import pallas as pl
from jax.experimental.pallas import tpu as pltpu


def _pick_tile(dim, candidates):
    """Largest candidate tile that evenly divides `dim`, else the full dim."""
    for c in candidates:
        if dim % c == 0:
            return c
    return dim


# ---------------------------------------------------------------------------
# Tiled linear:  (M, K) @ (K, N) + (1, N)
# ---------------------------------------------------------------------------
def _linear_kernel(x_ref, w_ref, b_ref, o_ref, acc_ref):
    k = pl.program_id(2)

    @pl.when(k == 0)
    def _():
        acc_ref[...] = jnp.zeros_like(acc_ref)

    acc_ref[...] += jnp.dot(
        x_ref[...].astype(jnp.bfloat16),
        w_ref[...].astype(jnp.bfloat16),
        preferred_element_type=jnp.float32,
    )

    @pl.when(k == pl.num_programs(2) - 1)
    def _():
        o_ref[...] = (acc_ref[...] + b_ref[...]).astype(o_ref.dtype)


def _linear(x, w, b, out_dtype=jnp.float32):
    """x: (M, K), w: (K, N), b: (1, N) -> (M, N) in out_dtype."""
    M, K = x.shape
    _, N = w.shape

    tm = _pick_tile(M, (256, 128, 64, 32, 16, 8))
    tk = _pick_tile(K, (512, 256, 128))
    tn = _pick_tile(N, (512, 256, 128))

    grid = (M // tm, N // tn, K // tk)

    cost = pl.CostEstimate(
        flops=int(2 * M * K * N),
        transcendentals=0,
        bytes_accessed=int(
            x.size * x.dtype.itemsize
            + w.size * w.dtype.itemsize
            + b.size * b.dtype.itemsize
            + M * N * jnp.dtype(out_dtype).itemsize
        ),
    )

    return pl.pallas_call(
        _linear_kernel,
        out_shape=jax.ShapeDtypeStruct((M, N), out_dtype),
        grid=grid,
        in_specs=[
            pl.BlockSpec((tm, tk), lambda i, j, k: (i, k)),
            pl.BlockSpec((tk, tn), lambda i, j, k: (k, j)),
            pl.BlockSpec((1, tn), lambda i, j, k: (0, j)),
        ],
        out_specs=pl.BlockSpec((tm, tn), lambda i, j, k: (i, j)),
        scratch_shapes=[pltpu.VMEM((tm, tn), jnp.float32)],
        compiler_params=pltpu.CompilerParams(
            dimension_semantics=("parallel", "parallel", "arbitrary"),
        ),
        cost_estimate=cost,
    )(x, w, b)


# ---------------------------------------------------------------------------
# Flash attention core over (B*H, N, head_dim)
# ---------------------------------------------------------------------------
def _flash_kernel(scale):
    def kernel(q_ref, k_ref, v_ref, o_ref, m_ref, l_ref, acc_ref):
        ki = pl.program_id(2)

        @pl.when(ki == 0)
        def _():
            m_ref[...] = jnp.full_like(m_ref, -jnp.inf)
            l_ref[...] = jnp.zeros_like(l_ref)
            acc_ref[...] = jnp.zeros_like(acc_ref)

        # scores tile: (tq, tkv) in f32 (contraction over head_dim, no transpose copy)
        s = lax.dot_general(
            q_ref[...], k_ref[...],
            (((1,), (1,)), ((), ())),
            preferred_element_type=jnp.float32,
        ) * scale

        m_prev = m_ref[...]
        m_new = jnp.maximum(m_prev, jnp.max(s, axis=-1, keepdims=True))
        alpha = jnp.exp(m_prev - m_new)
        p = jnp.exp(s - m_new)

        l_ref[...] = alpha * l_ref[...] + jnp.sum(p, axis=-1, keepdims=True)
        acc_ref[...] = alpha * acc_ref[...] + jnp.dot(
            p.astype(jnp.bfloat16), v_ref[...],
            preferred_element_type=jnp.float32,
        )
        m_ref[...] = m_new

        @pl.when(ki == pl.num_programs(2) - 1)
        def _():
            o_ref[...] = (
                acc_ref[...] * pl.reciprocal(l_ref[...], approx=True)
            ).astype(o_ref.dtype)

    return kernel


def _flash_attention(q, k, v, scale, out_dtype=jnp.bfloat16):
    """q, k, v: (B*H, N, hd) bf16 -> (B*H, N, hd) in out_dtype."""
    BH, N, hd = q.shape
    tq = _pick_tile(N, (256, 128, 64, 32, 16, 8))
    tkv = _pick_tile(N, (256, 128, 64, 32, 16, 8))

    grid = (BH, N // tq, N // tkv)

    cost = pl.CostEstimate(
        flops=int(4 * BH * N * N * hd),
        transcendentals=int(BH * N * N),
        bytes_accessed=int(
            (q.size + k.size + v.size) * q.dtype.itemsize
            + BH * N * hd * jnp.dtype(out_dtype).itemsize
        ),
    )

    return pl.pallas_call(
        _flash_kernel(scale),
        out_shape=jax.ShapeDtypeStruct((BH, N, hd), out_dtype),
        grid=grid,
        in_specs=[
            pl.BlockSpec((pl.Squeezed(), tq, hd), lambda b, qi, ki: (b, qi, 0)),
            pl.BlockSpec((pl.Squeezed(), tkv, hd), lambda b, qi, ki: (b, ki, 0)),
            pl.BlockSpec((pl.Squeezed(), tkv, hd), lambda b, qi, ki: (b, ki, 0)),
        ],
        out_specs=pl.BlockSpec((pl.Squeezed(), tq, hd), lambda b, qi, ki: (b, qi, 0)),
        scratch_shapes=[
            pltpu.VMEM((tq, 1), jnp.float32),   # running max m
            pltpu.VMEM((tq, 1), jnp.float32),   # running denom l
            pltpu.VMEM((tq, hd), jnp.float32),  # output accumulator
        ],
        compiler_params=pltpu.CompilerParams(
            dimension_semantics=("parallel", "parallel", "arbitrary"),
        ),
        cost_estimate=cost,
    )(q, k, v)


# ---------------------------------------------------------------------------
# Full MHSA forward
# ---------------------------------------------------------------------------
def mhsa_forward(x, w_qkv, b_qkv, w_out, b_out, num_heads):
    """x: (B, N, D) float32.  Returns (B, N, D) float32."""
    B, N, D = x.shape
    hd = D // num_heads
    scale = 1.0 / math.sqrt(hd)

    # 1) QKV projection over flattened rows; bf16 MXU operands, f32 output.
    x2 = x.reshape(B * N, D).astype(jnp.bfloat16)
    qkv = _linear(x2, w_qkv.astype(jnp.bfloat16), b_qkv, out_dtype=jnp.float32)

    # 2) Wrapper-side layout plumbing to lane-dense per-head slabs (B*H, N, hd).
    qkv = qkv.reshape(B, N, 3, num_heads, hd).astype(jnp.bfloat16)
    q = jnp.transpose(qkv[:, :, 0], (0, 2, 1, 3)).reshape(B * num_heads, N, hd)
    k = jnp.transpose(qkv[:, :, 1], (0, 2, 1, 3)).reshape(B * num_heads, N, hd)
    v = jnp.transpose(qkv[:, :, 2], (0, 2, 1, 3)).reshape(B * num_heads, N, hd)

    attn = _flash_attention(q, k, v, scale, out_dtype=jnp.bfloat16)  # (B*H, N, hd)

    # 3) Back to (B*N, D) and output projection.
    attn = jnp.transpose(attn.reshape(B, num_heads, N, hd), (0, 2, 1, 3))
    attn = attn.reshape(B * N, D)
    out = _linear(attn, w_out.astype(jnp.bfloat16), b_out, out_dtype=jnp.float32)
    return out.reshape(B, N, D)


def mhsa_reference(x, w_qkv, b_qkv, w_out, b_out, num_heads):
    """Pure-JAX f32 reference mirroring the PyTorch forward (eval mode)."""
    B, N, D = x.shape
    hd = D // num_heads
    qkv = x @ w_qkv + b_qkv                                   # (B, N, 3D)
    qkv = qkv.reshape(B, N, 3, num_heads, hd).transpose(2, 0, 3, 1, 4)
    q, k, v = qkv[0], qkv[1], qkv[2]                          # (B, H, N, hd)
    scores = (q @ jnp.swapaxes(k, -2, -1)) / math.sqrt(hd)
    probs = jax.nn.softmax(scores, axis=-1)
    out = (probs @ v).transpose(0, 2, 1, 3).reshape(B, N, D)
    return out @ w_out + b_out


if __name__ == "__main__":
    B, N, D = 2, 8, 32
    NUM_HEADS = 4

    key = jax.random.PRNGKey(0)
    kx, kw1, kb1, kw2, kb2 = jax.random.split(key, 5)

    x = jax.random.normal(kx, (B, N, D), dtype=jnp.float32)

    # nn.Linear(dim, dim*3) / nn.Linear(dim, dim), pre-transposed to "x @ W".
    w_qkv = jax.random.normal(kw1, (D, 3 * D), dtype=jnp.float32) * 0.05
    b_qkv = jax.random.normal(kb1, (1, 3 * D), dtype=jnp.float32) * 0.05
    w_out = jax.random.normal(kw2, (D, D), dtype=jnp.float32) * 0.05
    b_out = jax.random.normal(kb2, (1, D), dtype=jnp.float32) * 0.05

    fwd = jax.jit(functools.partial(mhsa_forward, num_heads=NUM_HEADS))
    out = jax.block_until_ready(fwd(x, w_qkv, b_qkv, w_out, b_out))

    ref = mhsa_reference(x, w_qkv, b_qkv, w_out, b_out, NUM_HEADS)
    assert out.shape == (B, N, D)
    # bf16 MXU operands vs f32 reference -> loosened tolerance.
    assert jnp.allclose(out, ref, atol=2e-2, rtol=2e-2), (
        "mismatch vs reference; max abs diff = "
        f"{float(jnp.max(jnp.abs(out - ref)))}"
    )

    print("KERNEL_OK")
</pallas_src>

<mosaic_0001>
module attributes {stable_mosaic.version = 11 : i64} {
  func.func @_linear_kernel(%arg0: i32, %arg1: i32, %arg2: i32, %arg3: memref<16x32xbf16, #tpu.memory_space<vmem>>, %arg4: memref<32x96xbf16, #tpu.memory_space<vmem>>, %arg5: memref<1x96xf32, #tpu.memory_space<vmem>>, %arg6: memref<16x96xf32, #tpu.memory_space<vmem>>, %arg7: memref<16x96xf32, #tpu.memory_space<vmem>>) attributes {dimension_semantics = [#tpu.dimension_semantics<parallel>, #tpu.dimension_semantics<parallel>, #tpu.dimension_semantics<arbitrary>], iteration_bounds = array<i64: 1, 1, 1>, scalar_prefetch = 0 : i64, scratch_operands = 1 : i64, tpu.core_type = #tpu.core_type<tc>, window_params = [{transform_indices = @transform_0, window_bounds = array<i64: 16, 32>}, {transform_indices = @transform_1, window_bounds = array<i64: 32, 96>}, {transform_indices = @transform_2, window_bounds = array<i64: 1, 96>}, {transform_indices = @transform_3, window_bounds = array<i64: 16, 96>}]} {
    %c0_i32 = arith.constant 0 : i32
    %0 = arith.cmpi eq, %arg2, %c0_i32 : i32
    %1 = arith.extui %0 : i1 to i32
    %c0_i32_0 = arith.constant 0 : i32
    %2 = arith.cmpi ne, %1, %c0_i32_0 : i32
    scf.if %2 {
      %cst_10 = arith.constant 0.000000e+00 : f32
      %12 = vector.broadcast %cst_10 : f32 to vector<16x96xf32>
      %c0_11 = arith.constant 0 : index
      %c0_12 = arith.constant 0 : index
      %13 = vector.load %arg7[%c0_11, %c0_12] : memref<16x96xf32, #tpu.memory_space<vmem>>, vector<16x96xf32>
      tpu.vector_store %arg7[%c0_11, %c0_12], %12 {strides = array<i32>} : memref<16x96xf32, #tpu.memory_space<vmem>>, vector<16x96xf32>,
    } else {
    }
    %c0 = arith.constant 0 : index
    %c0_1 = arith.constant 0 : index
    %3 = vector.load %arg7[%c0, %c0_1] : memref<16x96xf32, #tpu.memory_space<vmem>>, vector<16x96xf32>
    %c0_2 = arith.constant 0 : index
    %c0_3 = arith.constant 0 : index
    %4 = vector.load %arg3[%c0_2, %c0_3] : memref<16x32xbf16, #tpu.memory_space<vmem>>, vector<16x32xbf16>
    %c0_4 = arith.constant 0 : index
    %c0_5 = arith.constant 0 : index
    %5 = vector.load %arg4[%c0_4, %c0_5] : memref<32x96xbf16, #tpu.memory_space<vmem>>, vector<32x96xbf16>
    %cst = arith.constant dense<0.000000e+00> : vector<16x96xf32>
    %6 = tpu.matmul %4, %5, %cst {dimension_numbers = #tpu.dot_dimension_numbers<[1], [0], [0], [1], [0, 0, 1, 1], [], []>} : vector<16x32xbf16>, vector<32x96xbf16>, vector<16x96xf32> -> vector<16x96xf32>
    %7 = arith.addf %3, %6 : vector<16x96xf32>
    %c0_6 = arith.constant 0 : index
    %c0_7 = arith.constant 0 : index
    %8 = vector.load %arg7[%c0_6, %c0_7] : memref<16x96xf32, #tpu.memory_space<vmem>>, vector<16x96xf32>
    tpu.vector_store %arg7[%c0_6, %c0_7], %7 {strides = array<i32>} : memref<16x96xf32, #tpu.memory_space<vmem>>, vector<16x96xf32>,
    %c0_i32_8 = arith.constant 0 : i32
    %9 = arith.cmpi eq, %arg2, %c0_i32_8 : i32
    %10 = arith.extui %9 : i1 to i32
    %c0_i32_9 = arith.constant 0 : i32
    %11 = arith.cmpi ne, %10, %c0_i32_9 : i32
    scf.if %11 {
      %c0_10 = arith.constant 0 : index
      %c0_11 = arith.constant 0 : index
      %12 = vector.load %arg7[%c0_10, %c0_11] : memref<16x96xf32, #tpu.memory_space<vmem>>, vector<16x96xf32>
      %c0_12 = arith.constant 0 : index
      %c0_13 = arith.constant 0 : index
      %13 = vector.load %arg5[%c0_12, %c0_13] : memref<1x96xf32, #tpu.memory_space<vmem>>, vector<1x96xf32>
      %14 = vector.broadcast %13 : vector<1x96xf32> to vector<16x96xf32>
      %15 = arith.addf %12, %14 : vector<16x96xf32>
      %c0_14 = arith.constant 0 : index
      %c0_15 = arith.constant 0 : index
      %16 = vector.load %arg6[%c0_14, %c0_15] : memref<16x96xf32, #tpu.memory_space<vmem>>, vector<16x96xf32>
      tpu.vector_store %arg6[%c0_14, %c0_15], %15 {strides = array<i32>} : memref<16x96xf32, #tpu.memory_space<vmem>>, vector<16x96xf32>,
    } else {
    }
    return
  }
  func.func @transform_0(%arg0: i32, %arg1: i32, %arg2: i32) -> (i32, i32) {
    %c0_i32 = arith.constant 0 : i32
    return %arg0, %arg2 : i32, i32
  }
  func.func @transform_1(%arg0: i32, %arg1: i32, %arg2: i32) -> (i32, i32) {
    %c0_i32 = arith.constant 0 : i32
    return %arg2, %arg1 : i32, i32
  }
  func.func @transform_2(%arg0: i32, %arg1: i32, %arg2: i32) -> (i32, i32) {
    %c0_i32 = arith.constant 0 : i32
    %c0_i32_0 = arith.constant 0 : i32
    return %c0_i32, %arg1 : i32, i32
  }
  func.func @transform_3(%arg0: i32, %arg1: i32, %arg2: i32) -> (i32, i32) {
    %c0_i32 = arith.constant 0 : i32
    return %arg0, %arg1 : i32, i32
  }
}

module attributes {stable_mosaic.version = 11 : i64} {
  func.func @kernel(%arg0: i32, %arg1: i32, %arg2: i32, %arg3: memref<1x8x8xbf16, #tpu.memory_space<vmem>>, %arg4: memref<1x8x8xbf16, #tpu.memory_space<vmem>>, %arg5: memref<1x8x8xbf16, #tpu.memory_space<vmem>>, %arg6: memref<1x8x8xbf16, #tpu.memory_space<vmem>>, %arg7: memref<8x1xf32, #tpu.memory_space<vmem>>, %arg8: memref<8x1xf32, #tpu.memory_space<vmem>>, %arg9: memref<8x8xf32, #tpu.memory_space<vmem>>) attributes {dimension_semantics = [#tpu.dimension_semantics<parallel>, #tpu.dimension_semantics<parallel>, #tpu.dimension_semantics<arbitrary>], iteration_bounds = array<i64: 8, 1, 1>, scalar_prefetch = 0 : i64, scratch_operands = 3 : i64, tpu.core_type = #tpu.core_type<tc>, window_params = [{transform_indices = @transform_0, window_bounds = array<i64: 1, 8, 8>}, {transform_indices = @transform_1, window_bounds = array<i64: 1, 8, 8>}, {transform_indices = @transform_2, window_bounds = array<i64: 1, 8, 8>}, {transform_indices = @transform_3, window_bounds = array<i64: 1, 8, 8>}]} {
    %c0_i32 = arith.constant 0 : i32
    %0 = arith.cmpi eq, %arg2, %c0_i32 : i32
    %1 = arith.extui %0 : i1 to i32
    %c0_i32_0 = arith.constant 0 : i32
    %2 = arith.cmpi ne, %1, %c0_i32_0 : i32
    scf.if %2 {
      %cst_27 = arith.constant 0xFF800000 : f32
      %38 = vector.broadcast %cst_27 : f32 to vector<8x1xf32>
      %c0_28 = arith.constant 0 : index
      %c0_29 = arith.constant 0 : index
      %39 = vector.load %arg7[%c0_28, %c0_29] : memref<8x1xf32, #tpu.memory_space<vmem>>, vector<8x1xf32>
      tpu.vector_store %arg7[%c0_28, %c0_29], %38 {strides = array<i32>} : memref<8x1xf32, #tpu.memory_space<vmem>>, vector<8x1xf32>,
      %cst_30 = arith.constant 0.000000e+00 : f32
      %40 = vector.broadcast %cst_30 : f32 to vector<8x1xf32>
      %c0_31 = arith.constant 0 : index
      %c0_32 = arith.constant 0 : index
      %41 = vector.load %arg8[%c0_31, %c0_32] : memref<8x1xf32, #tpu.memory_space<vmem>>, vector<8x1xf32>
      tpu.vector_store %arg8[%c0_31, %c0_32], %40 {strides = array<i32>} : memref<8x1xf32, #tpu.memory_space<vmem>>, vector<8x1xf32>,
      %cst_33 = arith.constant 0.000000e+00 : f32
      %42 = vector.broadcast %cst_33 : f32 to vector<8x8xf32>
      %c0_34 = arith.constant 0 : index
      %c0_35 = arith.constant 0 : index
      %43 = vector.load %arg9[%c0_34, %c0_35] : memref<8x8xf32, #tpu.memory_space<vmem>>, vector<8x8xf32>
      tpu.vector_store %arg9[%c0_34, %c0_35], %42 {strides = array<i32>} : memref<8x8xf32, #tpu.memory_space<vmem>>, vector<8x8xf32>,
    } else {
    }
    %c0 = arith.constant 0 : index
    %c0_1 = arith.constant 0 : index
    %c0_2 = arith.constant 0 : index
    %3 = vector.load %arg3[%c0, %c0_1, %c0_2] : memref<1x8x8xbf16, #tpu.memory_space<vmem>>, vector<1x8x8xbf16>
    %4 = vector.shape_cast %3 : vector<1x8x8xbf16> to vector<8x8xbf16>
    %c0_3 = arith.constant 0 : index
    %c0_4 = arith.constant 0 : index
    %c0_5 = arith.constant 0 : index
    %5 = vector.load %arg4[%c0_3, %c0_4, %c0_5] : memref<1x8x8xbf16, #tpu.memory_space<vmem>>, vector<1x8x8xbf16>
    %6 = vector.shape_cast %5 : vector<1x8x8xbf16> to vector<8x8xbf16>
    %cst = arith.constant dense<0.000000e+00> : vector<8x8xf32>
    %7 = tpu.matmul %4, %6, %cst {dimension_numbers = #tpu.dot_dimension_numbers<[1], [1], [0], [0], [0, 0, 1, 0], [], []>} : vector<8x8xbf16>, vector<8x8xbf16>, vector<8x8xf32> -> vector<8x8xf32>
    %cst_6 = arith.constant 0.353553385 : f32
    %8 = vector.broadcast %cst_6 : f32 to vector<8x8xf32>
    %9 = arith.mulf %7, %8 : vector<8x8xf32>
    %c0_7 = arith.constant 0 : index
    %c0_8 = arith.constant 0 : index
    %10 = vector.load %arg7[%c0_7, %c0_8] : memref<8x1xf32, #tpu.memory_space<vmem>>, vector<8x1xf32>
    %cst_9 = arith.constant dense<0xFF800000> : vector<8xf32>
    %11 = vector.multi_reduction <maximumf>, %9, %cst_9 [1] : vector<8x8xf32> to vector<8xf32>
    %12 = vector.shape_cast %11 : vector<8xf32> to vector<8x1xf32>
    %13 = arith.maximumf %10, %12 : vector<8x1xf32>
    %14 = arith.subf %10, %13 : vector<8x1xf32>
    %15 = math.exp %14 : vector<8x1xf32>
    %16 = vector.broadcast %13 : vector<8x1xf32> to vector<8x8xf32>
    %17 = arith.subf %9, %16 : vector<8x8xf32>
    %18 = math.exp %17 : vector<8x8xf32>
    %c0_10 = arith.constant 0 : index
    %c0_11 = arith.constant 0 : index
    %19 = vector.load %arg8[%c0_10, %c0_11] : memref<8x1xf32, #tpu.memory_space<vmem>>, vector<8x1xf32>
    %20 = arith.mulf %15, %19 : vector<8x1xf32>
    %cst_12 = arith.constant dense<0.000000e+00> : vector<8xf32>
    %21 = vector.multi_reduction <add>, %18, %cst_12 [1] : vector<8x8xf32> to vector<8xf32>
    %22 = vector.shape_cast %21 : vector<8xf32> to vector<8x1xf32>
    %23 = arith.addf %20, %22 : vector<8x1xf32>
    %c0_13 = arith.constant 0 : index
    %c0_14 = arith.constant 0 : index
    %24 = vector.load %arg8[%c0_13, %c0_14] : memref<8x1xf32, #tpu.memory_space<vmem>>, vector<8x1xf32>
    tpu.vector_store %arg8[%c0_13, %c0_14], %23 {strides = array<i32>} : memref<8x1xf32, #tpu.memory_space<vmem>>, vector<8x1xf32>,
    %c0_15 = arith.constant 0 : index
    %c0_16 = arith.constant 0 : index
    %25 = vector.load %arg9[%c0_15, %c0_16] : memref<8x8xf32, #tpu.memory_space<vmem>>, vector<8x8xf32>
    %26 = vector.broadcast %15 : vector<8x1xf32> to vector<8x8xf32>
    %27 = arith.mulf %26, %25 : vector<8x8xf32>
    %28 = arith.truncf %18 : vector<8x8xf32> to vector<8x8xbf16>
    %c0_17 = arith.constant 0 : index
    %c0_18 = arith.constant 0 : index
    %c0_19 = arith.constant 0 : index
    %29 = vector.load %arg5[%c0_17, %c0_18, %c0_19] : memref<1x8x8xbf16, #tpu.memory_space<vmem>>, vector<1x8x8xbf16>
    %30 = vector.shape_cast %29 : vector<1x8x8xbf16> to vector<8x8xbf16>
    %cst_20 = arith.constant dense<0.000000e+00> : vector<8x8xf32>
    %31 = tpu.matmul %28, %30, %cst_20 {dimension_numbers = #tpu.dot_dimension_numbers<[1], [0], [0], [1], [0, 0, 1, 1], [], []>} : vector<8x8xbf16>, vector<8x8xbf16>, vector<8x8xf32> -> vector<8x8xf32>
    %32 = arith.addf %27, %31 : vector<8x8xf32>
    %c0_21 = arith.constant 0 : index
    %c0_22 = arith.constant 0 : index
    %33 = vector.load %arg9[%c0_21, %c0_22] : memref<8x8xf32, #tpu.memory_space<vmem>>, vector<8x8xf32>
    tpu.vector_store %arg9[%c0_21, %c0_22], %32 {strides = array<i32>} : memref<8x8xf32, #tpu.memory_space<vmem>>, vector<8x8xf32>,
    %c0_23 = arith.constant 0 : index
    %c0_24 = arith.constant 0 : index
    %34 = vector.load %arg7[%c0_23, %c0_24] : memref<8x1xf32, #tpu.memory_space<vmem>>, vector<8x1xf32>
    tpu.vector_store %arg7[%c0_23, %c0_24], %13 {strides = array<i32>} : memref<8x1xf32, #tpu.memory_space<vmem>>, vector<8x1xf32>,
    %c0_i32_25 = arith.constant 0 : i32
    %35 = arith.cmpi eq, %arg2, %c0_i32_25 : i32
    %36 = arith.extui %35 : i1 to i32
    %c0_i32_26 = arith.constant 0 : i32
    %37 = arith.cmpi ne, %36, %c0_i32_26 : i32
    scf.if %37 {
      %c0_27 = arith.constant 0 : index
      %c0_28 = arith.constant 0 : index
      %38 = vector.load %arg9[%c0_27, %c0_28] : memref<8x8xf32, #tpu.memory_space<vmem>>, vector<8x8xf32>
      %c0_29 = arith.constant 0 : index
      %c0_30 = arith.constant 0 : index
      %39 = vector.load %arg8[%c0_29, %c0_30] : memref<8x1xf32, #tpu.memory_space<vmem>>, vector<8x1xf32>
      %40 = tpu.reciprocal %39 {approx = true} : vector<8x1xf32> -> vector<8x1xf32>
      %41 = vector.broadcast %40 : vector<8x1xf32> to vector<8x8xf32>
      %42 = arith.mulf %38, %41 : vector<8x8xf32>
      %43 = arith.truncf %42 : vector<8x8xf32> to vector<8x8xbf16>
      %c0_31 = arith.constant 0 : index
      %c0_32 = arith.constant 0 : index
      %c0_33 = arith.constant 0 : index
      %44 = vector.load %arg6[%c0_31, %c0_32, %c0_33] : memref<1x8x8xbf16, #tpu.memory_space<vmem>>, vector<1x8x8xbf16>
      %45 = vector.shape_cast %44 : vector<1x8x8xbf16> to vector<8x8xbf16>
      %46 = vector.shape_cast %43 : vector<8x8xbf16> to vector<1x8x8xbf16>
      tpu.vector_store %arg6[%c0_31, %c0_32, %c0_33], %46 {strides = array<i32>} : memref<1x8x8xbf16, #tpu.memory_space<vmem>>, vector<1x8x8xbf16>,
    } else {
    }
    return
  }
  func.func @transform_0(%arg0: i32, %arg1: i32, %arg2: i32) -> (i32, i32, i32) {
    %c0_i32 = arith.constant 0 : i32
    %c0_i32_0 = arith.constant 0 : i32
    return %arg0, %arg1, %c0_i32 : i32, i32, i32
  }
  func.func @transform_1(%arg0: i32, %arg1: i32, %arg2: i32) -> (i32, i32, i32) {
    %c0_i32 = arith.constant 0 : i32
    %c0_i32_0 = arith.constant 0 : i32
    return %arg0, %arg2, %c0_i32 : i32, i32, i32
  }
  func.func @transform_2(%arg0: i32, %arg1: i32, %arg2: i32) -> (i32, i32, i32) {
    %c0_i32 = arith.constant 0 : i32
    %c0_i32_0 = arith.constant 0 : i32
    return %arg0, %arg2, %c0_i32 : i32, i32, i32
  }
  func.func @transform_3(%arg0: i32, %arg1: i32, %arg2: i32) -> (i32, i32, i32) {
    %c0_i32 = arith.constant 0 : i32
    %c0_i32_0 = arith.constant 0 : i32
    return %arg0, %arg1, %c0_i32 : i32, i32, i32
  }
}

module attributes {stable_mosaic.version = 11 : i64} {
  func.func @_linear_kernel(%arg0: i32, %arg1: i32, %arg2: i32, %arg3: memref<16x32xbf16, #tpu.memory_space<vmem>>, %arg4: memref<32x32xbf16, #tpu.memory_space<vmem>>, %arg5: memref<1x32xf32, #tpu.memory_space<vmem>>, %arg6: memref<16x32xf32, #tpu.memory_space<vmem>>, %arg7: memref<16x32xf32, #tpu.memory_space<vmem>>) attributes {dimension_semantics = [#tpu.dimension_semantics<parallel>, #tpu.dimension_semantics<parallel>, #tpu.dimension_semantics<arbitrary>], iteration_bounds = array<i64: 1, 1, 1>, scalar_prefetch = 0 : i64, scratch_operands = 1 : i64, tpu.core_type = #tpu.core_type<tc>, window_params = [{transform_indices = @transform_0, window_bounds = array<i64: 16, 32>}, {transform_indices = @transform_1, window_bounds = array<i64: 32, 32>}, {transform_indices = @transform_2, window_bounds = array<i64: 1, 32>}, {transform_indices = @transform_3, window_bounds = array<i64: 16, 32>}]} {
    %c0_i32 = arith.constant 0 : i32
    %0 = arith.cmpi eq, %arg2, %c0_i32 : i32
    %1 = arith.extui %0 : i1 to i32
    %c0_i32_0 = arith.constant 0 : i32
    %2 = arith.cmpi ne, %1, %c0_i32_0 : i32
    scf.if %2 {
      %cst_10 = arith.constant 0.000000e+00 : f32
      %12 = vector.broadcast %cst_10 : f32 to vector<16x32xf32>
      %c0_11 = arith.constant 0 : index
      %c0_12 = arith.constant 0 : index
      %13 = vector.load %arg7[%c0_11, %c0_12] : memref<16x32xf32, #tpu.memory_space<vmem>>, vector<16x32xf32>
      tpu.vector_store %arg7[%c0_11, %c0_12], %12 {strides = array<i32>} : memref<16x32xf32, #tpu.memory_space<vmem>>, vector<16x32xf32>,
    } else {
    }
    %c0 = arith.constant 0 : index
    %c0_1 = arith.constant 0 : index
    %3 = vector.load %arg7[%c0, %c0_1] : memref<16x32xf32, #tpu.memory_space<vmem>>, vector<16x32xf32>
    %c0_2 = arith.constant 0 : index
    %c0_3 = arith.constant 0 : index
    %4 = vector.load %arg3[%c0_2, %c0_3] : memref<16x32xbf16, #tpu.memory_space<vmem>>, vector<16x32xbf16>
    %c0_4 = arith.constant 0 : index
    %c0_5 = arith.constant 0 : index
    %5 = vector.load %arg4[%c0_4, %c0_5] : memref<32x32xbf16, #tpu.memory_space<vmem>>, vector<32x32xbf16>
    %cst = arith.constant dense<0.000000e+00> : vector<16x32xf32>
    %6 = tpu.matmul %4, %5, %cst {dimension_numbers = #tpu.dot_dimension_numbers<[1], [0], [0], [1], [0, 0, 1, 1], [], []>} : vector<16x32xbf16>, vector<32x32xbf16>, vector<16x32xf32> -> vector<16x32xf32>
    %7 = arith.addf %3, %6 : vector<16x32xf32>
    %c0_6 = arith.constant 0 : index
    %c0_7 = arith.constant 0 : index
    %8 = vector.load %arg7[%c0_6, %c0_7] : memref<16x32xf32, #tpu.memory_space<vmem>>, vector<16x32xf32>
    tpu.vector_store %arg7[%c0_6, %c0_7], %7 {strides = array<i32>} : memref<16x32xf32, #tpu.memory_space<vmem>>, vector<16x32xf32>,
    %c0_i32_8 = arith.constant 0 : i32
    %9 = arith.cmpi eq, %arg2, %c0_i32_8 : i32
    %10 = arith.extui %9 : i1 to i32
    %c0_i32_9 = arith.constant 0 : i32
    %11 = arith.cmpi ne, %10, %c0_i32_9 : i32
    scf.if %11 {
      %c0_10 = arith.constant 0 : index
      %c0_11 = arith.constant 0 : index
      %12 = vector.load %arg7[%c0_10, %c0_11] : memref<16x32xf32, #tpu.memory_space<vmem>>, vector<16x32xf32>
      %c0_12 = arith.constant 0 : index
      %c0_13 = arith.constant 0 : index
      %13 = vector.load %arg5[%c0_12, %c0_13] : memref<1x32xf32, #tpu.memory_space<vmem>>, vector<1x32xf32>
      %14 = vector.broadcast %13 : vector<1x32xf32> to vector<16x32xf32>
      %15 = arith.addf %12, %14 : vector<16x32xf32>
      %c0_14 = arith.constant 0 : index
      %c0_15 = arith.constant 0 : index
      %16 = vector.load %arg6[%c0_14, %c0_15] : memref<16x32xf32, #tpu.memory_space<vmem>>, vector<16x32xf32>
      tpu.vector_store %arg6[%c0_14, %c0_15], %15 {strides = array<i32>} : memref<16x32xf32, #tpu.memory_space<vmem>>, vector<16x32xf32>,
    } else {
    }
    return
  }
  func.func @transform_0(%arg0: i32, %arg1: i32, %arg2: i32) -> (i32, i32) {
    %c0_i32 = arith.constant 0 : i32
    return %arg0, %arg2 : i32, i32
  }
  func.func @transform_1(%arg0: i32, %arg1: i32, %arg2: i32) -> (i32, i32) {
    %c0_i32 = arith.constant 0 : i32
    return %arg2, %arg1 : i32, i32
  }
  func.func @transform_2(%arg0: i32, %arg1: i32, %arg2: i32) -> (i32, i32) {
    %c0_i32 = arith.constant 0 : i32
    %c0_i32_0 = arith.constant 0 : i32
    return %c0_i32, %arg1 : i32, i32
  }
  func.func @transform_3(%arg0: i32, %arg1: i32, %arg2: i32) -> (i32, i32) {
    %c0_i32 = arith.constant 0 : i32
    return %arg0, %arg1 : i32, i32
  }
}

</mosaic_0001>

<bundles_post_ra>
// kernel: mhsa_forward.3
= control target key start
LH: loop header
LB: loop body
LE: loop exit
PB: predicated region body
PF: predicated region fallthrough
CT: control target
= control target key end

     0   :  { %vm19_vm0 = vcmask 785408   ;;  %v138_v0 = vmov 0.0   ;;  %vm139_vm1 = vmmov 0   ;;  %vm47_vm2 = vcmask 261120   ;;  %s184_s1 = inlined_call_operand.vmem [shape: bf16[32,96], index: 1, kind: input, shape index: {}]   ;;  %s185_s0 = inlined_call_operand.vmem [shape: bf16[16,32], index: 0, kind: input, shape index: {}]   ;;  %s186_s2 = inlined_call_operand.vmem [shape: f32[1,96], index: 2, kind: input, shape index: {}]   ;;  %s187_s3 = inlined_call_operand.vmem [shape: f32[16,96], index: 3, kind: output, shape index: {}]  }
   0x1   :  { %125 = vmatprep.subr.bf16.mxu0 %v138_v0  ;;  %v135_v1 = vld [vmem:[%s184_s1 + $0x8] sm:$0xff]   ;;  %129 = vmatprep.mubr.msk.bf16.mxu0 %vm139_vm1, %v138_v0  ;;  %20 = vst.msk [vmem:[#allocation2] sm:$0xff] %vm19_vm0, %v138_v0  ;;  %21 = vst.msk [vmem:[#allocation2 + $0x8] sm:$0xff] %vm19_vm0, %v138_v0  ;;  %v136_v2 = vld [vmem:[%s184_s1] sm:$0xff]  }
   0x2   :  { %126 = vmatpush3.bf16.msra.mxu0 %v135_v1  ;;  %v137_v3 = vld [vmem:[%s185_s0] sm:$0xff]  }
   0x3   :  { %127 = vmatprep.subr.bf16.mxu0 %v138_v0  ;;  %v121_v12 = vld [vmem:[%s186_s2] ss:$0 sm:$0xff] }
   0x6   :  { %128 = vmatpush3.bf16.msra.mxu0 %v136_v2 }
   0x8   :  { %v22_v4 = vld [vmem:[#allocation2] sm:$0xff]  ;;  %v23_v8 = vld [vmem:[#allocation2 + $0x8] sm:$0xff] }
   0x9   :  { %130 = vmatmul.mubr.msk.bf16.vlgmr.msra.gmra.mxu0 %vm47_vm2, %v137_v3 }
  0xc9   :  { %v85_v5 = vpop.f32.mrf.mxu0 }
  0xca   :  { %v92_v6 = vadd.f32 %v85_v5, %v22_v4 }
  0xcb   :  { %v131_v7 = vpop.f32.mrf.mxu0 }
  0xcc   :  { %95 = vst.msk [vmem:[#allocation2] sm:$0xff] %vm19_vm0, %v92_v6 }
  0xcd   :  { %v88_v9 = vpop.f32.mrf.mxu0 }
  0xce   :  { %v93_v10 = vadd.f32 %v88_v9, %v23_v8 }
  0xcf   :  { %v132_v11 = vpop.f32.mrf.mxu0 }
  0xd0   :  { %96 = vst.msk [vmem:[#allocation2 + $0x8] sm:$0xff] %vm19_vm0, %v93_v10 }
  0xd3   :  { %v100_v13 = vld [vmem:[#allocation2] sm:$0xff] }
  0xd4   :  { %v109_v14 = vadd.f32 %v121_v12, %v100_v13 }
  0xd6   :  { %111 = vst.msk [vmem:[%s187_s3] sm:$0xff] %vm19_vm0, %v109_v14 }
  0xd7   :  { %v101_v15 = vld [vmem:[#allocation2 + $0x8] sm:$0xff] }
  0xd8   :  { %v110_v16 = vadd.f32 %v121_v12, %v101_v15 }
  0xda   :  { %112 = vst.msk [vmem:[%s187_s3 + $0x8] sm:$0xff] %vm19_vm0, %v110_v16 }

// kernel: mhsa_forward.4
= control target key start
LH: loop header
LB: loop body
LE: loop exit
PB: predicated region body
PF: predicated region fallthrough
CT: control target
= control target key end

     0   :  { %s638_s12 = smov 0   ;;  %s640_s13 = smov 0   ;;  %s694_s0 = inlined_call_operand.vmem [shape: bf16[8,8,8], index: 0, kind: input, shape index: {}]   ;;  %s695_s1 = inlined_call_operand.vmem [shape: bf16[8,8,8], index: 1, kind: input, shape index: {}]   ;;  %s696_s2 = inlined_call_operand.vmem [shape: bf16[8,8,8], index: 2, kind: input, shape index: {}]   ;;  %s697_s3 = inlined_call_operand.vmem [shape: bf16[8,8,8], index: 3, kind: output, shape index: {}]  }
   0x1   :  { %s642_s14 = smov 0  }
   0x2 LB: > { %s32_s15 = sadd.s32 1, %s608_s13  ;;  %p529_p0 = scmp.ge.s32.totalorder %s612_s14, 1  ;;  %s612_s14 = sphi %s642_s14, %s13_s14   ;;  %s608_s13 = sphi %s640_s13, %s699_s13   ;;  %s604_s12 = sphi %s638_s12, %s698_s12  }
   0x3   : > { %p34_p1 = scmp.ge.s32.totalorder %s32_s15, 8  ;;  %p190_p2 = scmp.lt.s32.totalorder %s612_s14, 9 }
   0x5   : > { %s701_s15 = smov (%p34_p1, %s32_s15), 0  ;;  %p191_p3 = pnand %p529_p0, %p190_p2 }
   0x6   : > { %p232_p4 = scmp.lt.s32.totalorder (!%p191_p3), %s604_s12, 7 }
   0x7   : > { %194 = sbr.rel (%p191_p3) target bundleno = 794 (0x31a), region = 32 }
   0xc   : > { %vm268_vm0 = vcmask 64512   ;;  %v614_v0 = vmov 0.0   ;;  %vm615_vm1 = vmmov 0   ;;  %s703_s12 = smov (!%p232_p4, %s604_s12), 7  ;;  %vm265_vm2 = vcmask 7168  }
   0xd   : > { %542 = vmatprep.subr.bf16.mxu0 %v614_v0  ;;  %269 = vst.msk [vmem:[#allocation4] sm:$0xff] %vm268_vm0, %v614_v0  ;;  %544 = vmatprep.mubr.msk.bf16.mxu0 %vm615_vm1, %v614_v0  ;;  %s657_s16 = sshll.u32 %s703_s12, 2  ;;  %v616_v4 = vmov -inf   ;;  %v617_v11 = vmov 0   ;;  %vm356_vm3 = vcmask 1043456   ;;  %vm416_vm4 = vcmask 60416  }
   0xe   : > { %548 = vmatprep.subr.bf16.mxu1 %v614_v0  ;;  %550 = vmatprep.mubr.msk.bf16.mxu1 %vm615_vm1, %v614_v0  ;;  %s245_s19 = scalar_lea.vmem %s695_s1, %s657_s16  ;;  %s238_s22 = scalar_lea.vmem %s694_s0, %s657_s16  ;;  %266 = vst.msk [vmem:[#allocation2] sm:$0xff] %vm265_vm2, %v616_v4  ;;  %267 = vst.msk [vmem:[#allocation3] sm:$0xff] %vm265_vm2, %v614_v0 }
   0xf   : > { %v271_v1 = vld [vmem:[%s245_s19] sm:$0xf]  ;;  %582 = vset.pattern.permute.xlu0 %v617_v11  ;;  %583 = vset.pattern.permute.xlu1 %v617_v11  ;;  %s252_s25 = scalar_lea.vmem %s696_s2, %s657_s16  ;;  %s259_s28 = scalar_lea.vmem %s697_s3, %s657_s16 }
  0x10   : > { %v277_v2 = vsel %vm268_vm0, %v271_v1, 0  ;;  %v270_v3 = vld [vmem:[%s238_s22] sm:$0xf] }
  0x11   : > { %543 = vmatpush3.bf16.xpose.msra.mxu0 %v277_v2  ;;  %v352_v16 = vld [vmem:[%s252_s25] sm:$0xf] }
  0x12   : > { %v358_v17 = vsel %vm356_vm3, %v352_v16, 0 }
  0x13   : > { %549 = vmatpush3.bf16.msra.mxu1 %v358_v17 }
  0x14   : > { %v344_v32 = vld [vmem:[#allocation4] sm:$0xff] }
  0x15   : > { %v320_v12 = vld [vmem:[#allocation2] sm:$0xff]  ;;  %v336_v26 = vld [vmem:[#allocation3] sm:$0xff] }
  0x18   : > { %545 = vmatmul.mubr.msk.bf16.vlgmr.msra.gmra.mxu0 %vm268_vm0, %v270_v3 }
  0xd8   : > { %v313_v5 = vpop.f32.mrf.mxu0 }
  0xd9   : > { %v319_v6 = vmul.f32 0.35355338, %v313_v5 }
  0xda   : > { %v546_v7 = vpop.f32.mrf.mxu0 }
  0xdb   : > { %v321_v8 = vsel %vm268_vm0, %v319_v6, -inf }
  0xdc   : > { %322 = vmax.xlane.f32.xlu0 %v321_v8  ;;  %v316_v9 = vpop.f32.mrf.mxu0 }
  0xde   : > { %v547_v10 = vpop.f32.mrf.mxu0 }
 0x165   : > { %v323_v13 = vpop.xlane.xlu0 %322 }
 0x166   : > { %v324_v14 = vmax.f32 %v320_v12, %v323_v13 }
 0x168   : > { %v325_v15 = vsub.f32 %v320_v12, %v324_v14  ;;  %402 = vst.msk [vmem:[#allocation2] sm:$0xff] %vm265_vm2, %v324_v14  ;;  %330 = vperm.xlu0 %582, %v324_v14  }
 0x16a   : > { %v326_v22 = vmul.f32 1.442695, %v325_v15 }
 0x1e3   : > { %v331_v18 = vpop.permute.xlu0 %330 }
 0x1e4   : > { %v333_v19 = vsub.f32 %v319_v6, %v331_v18 }
 0x1e6   : > { %v334_v20 = vmul.f32 1.442695, %v333_v19 }
 0x1e8   : > { %584 = vpow2.f32 %v334_v20 }
 0x1e9   : > { %586 = vpow2.f32 %v326_v22 }
 0x1f5   : > { %v585_v21 = vpop.eup %584 }
 0x1f6   : > { %v338_v23 = vsel %vm268_vm0, %v585_v21, 0.0  ;;  %v351_v24 = vpack.c.bf16 %v585_v21, %v585_v21  ;;  %v587_v25 = vpop.eup %586 }
 0x1f7   : > { %339 = vadd.xlane.f32.xlu1 %v338_v23  ;;  %v337_v27 = vmul.f32 %v587_v25, %v336_v26 }
 0x1f8   : > { %551 = vmatmul.mubr.msk.bf16.vlgmr.msra.gmra.mxu1 %vm268_vm0, %v351_v24 }
 0x208   : > { %347 = vperm.xlu1 %583, %v587_v25  }
 0x280   : > { %v340_v28 = vpop.xlane.xlu1 %339 }
 0x281   : > { %v341_v29 = vadd.f32 %v340_v28, %v337_v27 }
 0x283   : > { %343 = vst.msk [vmem:[#allocation3] sm:$0xff] %vm265_vm2, %v341_v29 }
 0x284   : > { %v348_v33 = vpop.permute.xlu1 %347 }
 0x285   : > { %v350_v34 = vmul.f32 %v348_v33, %v344_v32 }
 0x28a   : > { %v407_v30 = vld [vmem:[#allocation3] sm:$0xff] }
 0x28b   : > { %588 = vrcp.f32 %v407_v30 }
 0x298   : > { %v589_v31 = vpop.eup %588 }
 0x299   : > { %411 = vperm.xlu1 %583, %v589_v31  }
 0x2b8   : > { %v394_v35 = vpop.f32.mrf.mxu1 }
 0x2b9   : > { %v400_v36 = vadd.f32 %v394_v35, %v350_v34 }
 0x2ba   : > { %v552_v37 = vpop.f32.mrf.mxu1 }
 0x2bb   : > { %401 = vst.msk [vmem:[#allocation4] sm:$0xff] %vm268_vm0, %v400_v36 }
 0x2bc   : > { %v397_v38 = vpop.f32.mrf.mxu1 }
 0x2be   : > { %v553_v39 = vpop.f32.mrf.mxu1 }
 0x2c2   : > { %v406_v40 = vld [vmem:[#allocation4] sm:$0xff] }
 0x314   : > { %v412_v41 = vpop.permute.xlu1 %411 }
 0x315   : > { %v414_v42 = vmul.f32 %v412_v41, %v406_v40 }
 0x317   : > { %v415_v43 = vpack.c.bf16 %v414_v42, %v414_v42 }
 0x319   : > { %417 = vst.msk [vmem:[%s259_s28] sm:$0xf] %vm416_vm4, %v415_v43 }
 0x31a PF: > { %s13_s14 = sadd.s32 1, %s612_s14   ;;  %s698_s12 = smov %s608_s13 }
 0x31b   : > { %p10_p5 = scmp.ge.s32.totalorder %s13_s14, 10   ;;  %s699_s13 = smov %s701_s15 }
 0x31d   :  { %12 = sbr.rel (!%p10_p5) target bundleno = 2 (0x2), region = 76 }

// kernel: mhsa_forward.5
= control target key start
LH: loop header
LB: loop body
LE: loop exit
PB: predicated region body
PF: predicated region fallthrough
CT: control target
= control target key end

     0   :  { %v175_v1 = vmov 0.0   ;;  %vm176_vm0 = vmmov 0   ;;  %vm20_vm1 = vcmask 261120   ;;  %s222_s0 = inlined_call_operand.vmem [shape: bf16[16,32], index: 0, kind: input, shape index: {}]   ;;  %s223_s1 = inlined_call_operand.vmem [shape: bf16[32,32], index: 1, kind: input, shape index: {}]   ;;  %s224_s2 = inlined_call_operand.vmem [shape: f32[1,32], index: 2, kind: input, shape index: {}]   ;;  %s225_s3 = inlined_call_operand.hbm [shape: f32[16,32], index: 3, kind: output, shape index: {}]  }
   0x1   :  { %v150_v0 = vld [vmem:[%s223_s1 + $0x8] sm:$0xff]   ;;  %137 = vmatprep.subr.bf16.mxu0 %v175_v1  ;;  %v151_v2 = vld [vmem:[%s223_s1] sm:$0xff]   ;;  %141 = vmatprep.mubr.msk.bf16.mxu0 %vm176_vm0, %v175_v1  ;;  %21 = vst.msk [vmem:[#allocation2] sm:$0xff] %vm20_vm1, %v175_v1  ;;  %22 = vst.msk [vmem:[#allocation2 + $0x8] sm:$0xff] %vm20_vm1, %v175_v1 }
   0x2   :  { %138 = vmatpush3.bf16.msra.mxu0 %v150_v0 }
   0x3   :  { %139 = vmatprep.subr.bf16.mxu0 %v175_v1 }
   0x4   :  { %8 = vsyncpa [#allocation4], 0  ;;  %v152_v3 = vld [vmem:[%s222_s0] sm:$0xff]   ;;  %s177_s0 = smov [#allocation3]  }
   0x5   :  { %v133_v12 = vld [vmem:[%s224_s2] ss:$0 sm:$0xff]  ;;  %s118_s19 = sshll.u32 %s177_s0, 4  ;;  %s119_s19 = int_to_ptr.vmem [resolvable:$true] %s118_s19 }
   0x6   :  { %140 = vmatpush3.bf16.msra.mxu0 %v151_v2  ;;  %s153_s20 = scalar_lea.vmem %s119_s19, 256  ;;  %p158_p1 = scmp.lt.s32.totalorder %s119_s19, %s119_s19 }
   0x7   :  { %p154_p0 = scmp.ne.s32.totalorder %s119_s19, %s153_s20  ;;  %p159_p2 = scmp.lt.s32.totalorder %s153_s20, %s153_s20 }
   0x8   :  { %v23_v4 = vld [vmem:[#allocation2] sm:$0xff]  ;;  %v24_v8 = vld [vmem:[#allocation2 + $0x8] sm:$0xff] }
   0x9   :  { %142 = vmatmul.mubr.msk.bf16.vlgmr.msra.gmra.mxu0 %vm20_vm1, %v152_v3  ;;  %p160_p3 = por %p159_p2, %p158_p1 }
   0xb   :  { %p161_p4 = pnand %p160_p3, %p154_p0 }
  0xc9   :  { %v86_v5 = vpop.f32.mrf.mxu0 }
  0xca   :  { %v93_v6 = vadd.f32 %v86_v5, %v23_v4 }
  0xcb   :  { %v143_v7 = vpop.f32.mrf.mxu0 }
  0xcc   :  { %95 = vst.msk [vmem:[#allocation2] sm:$0xff] %vm20_vm1, %v93_v6 }
  0xcd   :  { %v89_v9 = vpop.f32.mrf.mxu0 }
  0xce   :  { %v94_v10 = vadd.f32 %v89_v9, %v24_v8 }
  0xcf   :  { %v144_v11 = vpop.f32.mrf.mxu0 }
  0xd0   :  { %96 = vst.msk [vmem:[#allocation2 + $0x8] sm:$0xff] %vm20_vm1, %v94_v10 }
  0xd3   :  { %v100_v13 = vld [vmem:[#allocation2] sm:$0xff] }
  0xd4   :  { %v109_v14 = vadd.f32 %v133_v12, %v100_v13 }
  0xd6   :  { %111 = vst.msk [vmem:[#allocation3] sm:$0xff] %vm20_vm1, %v109_v14 }
  0xd7   :  { %v101_v15 = vld [vmem:[#allocation2 + $0x8] sm:$0xff] }
  0xd8   :  { %v110_v16 = vadd.f32 %v133_v12, %v101_v15 }
  0xda   :  { %112 = vst.msk [vmem:[#allocation3 + $0x8] sm:$0xff] %vm20_vm1, %v110_v16 }
  0xdb   :  { %164 = shalt.err (!%p161_p4)
}
  0xdc   :  { %s178_s21 = smov 128   ;;  %s179_s2 = smov 8  }
  0xdd   :  { %124 = dma.vmem_to_hbm [thread:$0]  %s119_s19, 256, %s225_s3, [#allocation4], %s178_s21, %s178_s21, %s179_s2  }
  0xde   :  { %173 = dma.done.wait [#allocation4], 256  }
  0xdf   :  { %174 = vsyncadd [#allocation4], 4294967040 }
  0xe0   :  { %128 = vsyncpa [#allocation4], 1 }

</bundles_post_ra>
